<compile_context>
chip_gen: v5e
topology: v5e:2x2
jax: 0.10.0
libtpu: 0.0.40
codegen_flags: <defaults>
</compile_context>

<pallas_src>
import functools

import jax
import jax.numpy as jnp
import numpy as np
from jax import lax
from jax.experimental import pallas as pl
from jax.experimental.pallas import tpu as pltpu  # noqa: F401  (future tiling work)

# ---------------------------------------------------------------------------
# Problem sizes (small, consistent with the module: in_dim -> H heads x D dims)
# ---------------------------------------------------------------------------
N_NODES = 16
N_EDGES = 32
IN_DIM = 32
NUM_HEADS = 4
OUT_DIM = 8                       # per-head out_dim
HD = NUM_HEADS * OUT_DIM          # 32
PAD_W = 128                       # lane-dense output width (sliced back to HD outside)
CLAMP = 5.0                       # clamp=5.0 in the module
# dropout=0.0 and act=None -> both are identity at inference.


# ---------------------------------------------------------------------------
# Fused Pallas kernel
# ---------------------------------------------------------------------------
def _grit_fused_kernel(sd_col_ref, dst_row_ref, x_ref, ea_ref,
                       w_all_ref, b_all_ref, awfull_ref, vr_ref,
                       wv_ref, we_ref, *, clamp):
    f32, bf16 = jnp.float32, jnp.bfloat16
    n = x_ref.shape[0]
    e = ea_ref.shape[0]
    hd = awfull_ref.shape[0]
    pad_w = wv_ref.shape[1]

    # ---- fused node+edge projection: one MXU push [N+E, IN] @ [IN, 5HD] ----------
    xe = jnp.concatenate([x_ref[...], ea_ref[...]], axis=0)              # [N+E, IN]
    proj = jnp.dot(xe, w_all_ref[...], preferred_element_type=f32) + b_all_ref[...]
    qkv = proj[:n, :3 * hd]                                              # [N, 3HD] = [Q|K|V]
    ew = proj[n:, 3 * hd:4 * hd]                                         # [E, HD]  E_w (head-major)
    eb = proj[n:, 4 * hd:]                                               # [E, HD]  E_b (head-major)

    # ---- one-hot gather / scatter matrices built in-kernel from index vectors ----
    # stacked [src|dst] gather one-hot (edge index along sublanes -> column input)
    oh2 = jnp.where(
        sd_col_ref[...] == lax.broadcasted_iota(jnp.int32, (2 * e, n), 1),
        1.0, 0.0)                                                        # [2E, N] f32 (exact)
    # scatter one-hot dst^T (node index along sublanes, edge along lanes -> row input)
    dst_oh_t = jnp.where(
        lax.broadcasted_iota(jnp.int32, (n, e), 0) == dst_row_ref[...],
        1.0, 0.0)                                                        # [N, E] f32 (exact)

    # ---- fused gathers: one MXU push [2E, N] @ [N, 3HD] --------------------------
    gathered = jnp.dot(oh2.astype(bf16), qkv.astype(bf16),
                       preferred_element_type=f32)                       # [2E, 3HD]
    k_src = gathered[:e, hd:2 * hd]                                      # K[src]  [E, HD]
    v_src = gathered[:e, 2 * hd:]                                        # V[src]  [E, HD]
    q_dst = gathered[e:, :hd]                                            # Q[dst]  [E, HD]

    # ---- per-edge score (f32 elementwise on VPU/EUP) -----------------------------
    score = (k_src + q_dst) * ew
    sq = jnp.sqrt(jnp.abs(score))                                        # single sqrt chain
    score = jnp.where(score >= 0.0, sq, -sq) + eb                        # signed sqrt + E_b
    # batch.wE (act = Identity, dropout = 0); pad to 128 lanes -> unmasked store.
    we_ref[...] = jnp.concatenate(
        [score, jnp.zeros((e, pad_w - hd), f32)], axis=1)

    # ---- attention logits replicated to full HD lane width -----------------------
    # AwFull = blockdiag_h(Aw[:, h, 0] broadcast across the head's D columns), so the
    # softmax runs at width HD and no attn-broadcast matmul is needed afterwards.
    logits = jnp.dot(score.astype(bf16), awfull_ref[...],
                     preferred_element_type=f32)                         # [E, HD]
    logits = jnp.clip(logits, -clamp, clamp)
    # |logits| <= clamp (small), so exp is bounded -> segment-max subtraction skipped.
    expv = jnp.exp(logits)                                               # [E, HD]

    # ---- segment softmax denominator (kept f32: tiny matmuls, tighter parity) ----
    seg_sum = jnp.dot(dst_oh_t, expv, preferred_element_type=f32)        # [N, HD]
    dst_oh = oh2[e:, :]                                                  # [E, N] f32
    denom = jnp.dot(dst_oh, seg_sum, preferred_element_type=f32)         # [E, HD]
    attn = expv * pl.reciprocal(denom + 1e-16, approx=True)              # [E, HD]

    # ---- scatter-add of V-messages and edge-enhance rows (one matmul) ------------
    msgs = jnp.concatenate([v_src * attn, score * attn], axis=1)         # [E, 2HD] f32
    agg = jnp.dot(dst_oh_t, msgs, preferred_element_type=f32)            # [N, 2HD]
    rowv = jnp.dot(agg[:, hd:].astype(bf16), vr_ref[...],
                   preferred_element_type=f32)                           # [N, HD]
    wv = agg[:, :hd] + rowv
    wv_ref[...] = jnp.concatenate(
        [wv, jnp.zeros((n, pad_w - hd), f32)], axis=1)


def grit_forward(x, edge_attr, edge_index, params, *, clamp=CLAMP):
    """Single fused pallas_call for the whole GRIT-sparse-MHA forward pass."""
    # The kernel skips the segment-max before exp; that is only numerically safe
    # because |logits| <= clamp.  Reinstate the segment-max if clamp is ever
    # disabled or made large (the module exposes it).
    assert clamp is not None and abs(clamp) <= 16.0, \
        "segment-max-free softmax requires a small clamp"
    n, e = x.shape[0], edge_attr.shape[0]
    src = edge_index[0].astype(jnp.int32)
    dst = edge_index[1].astype(jnp.int32)
    sd_col = jnp.concatenate([src, dst], axis=0).reshape(2 * e, 1)   # gather one-hot indices
    dst_row = dst.reshape(1, e)                                      # scatter one-hot indices

    kern = functools.partial(_grit_fused_kernel, clamp=float(abs(clamp)))
    wv_pad, we_pad = pl.pallas_call(
        kern,
        out_shape=(jax.ShapeDtypeStruct((n, PAD_W), jnp.float32),
                   jax.ShapeDtypeStruct((e, PAD_W), jnp.float32)),
        # no grid: single program, whole arrays resident in VMEM (tiny sizes)
    )(sd_col, dst_row, x, edge_attr,
      params["WAll"], params["bAll"], params["AwFull"], params["VR"])
    # Outputs were padded to 128 lanes for unmasked stores; slice back to HD.
    return wv_pad[:, :HD], we_pad[:, :HD]


# ---------------------------------------------------------------------------
# Pure-JAX reference (mirrors the PyTorch forward) for verification
# ---------------------------------------------------------------------------
def reference_forward(x, edge_attr, edge_index, params):
    src, dst = edge_index[0], edge_index[1]
    n = x.shape[0]
    Qh = (x @ params["Wq"] + params["bq"]).reshape(n, NUM_HEADS, OUT_DIM)
    Kh = (x @ params["Wk"] + params["bk"]).reshape(n, NUM_HEADS, OUT_DIM)
    Vh = (x @ params["Wv"] + params["bv"]).reshape(n, NUM_HEADS, OUT_DIM)
    Eproj = (edge_attr @ params["We"] + params["be"]).reshape(-1, NUM_HEADS, 2 * OUT_DIM)
    Ew3, Eb3 = Eproj[:, :, :OUT_DIM], Eproj[:, :, OUT_DIM:]

    score = (Kh[src] + Qh[dst]) * Ew3
    score = jnp.sqrt(jnp.maximum(score, 0.0)) - jnp.sqrt(jnp.maximum(-score, 0.0))
    score = score + Eb3
    e_t = score
    wE = score.reshape(score.shape[0], -1)

    logits = jnp.einsum("ehd,dhc->ehc", score, params["Aw"])
    logits = jnp.clip(logits, -CLAMP, CLAMP)
    seg_max = jax.ops.segment_max(logits, dst, num_segments=n)
    expv = jnp.exp(logits - seg_max[dst])
    seg_sum = jax.ops.segment_sum(expv, dst, num_segments=n)
    attn = expv / (seg_sum[dst] + 1e-16)

    wV = jax.ops.segment_sum(Vh[src] * attn, dst, num_segments=n)
    rowV = jax.ops.segment_sum(e_t * attn, dst, num_segments=n)
    rowV = jnp.einsum("nhd,dhc->nhc", rowV, params["VeRow"])
    wV = wV + rowV
    return wV.reshape(n, -1), wE


# ---------------------------------------------------------------------------
# Deterministic parameter init (xavier-normal-like, as in the module __init__)
# plus one-time host-side repacking into the kernel's fused / permuted layout.
# ---------------------------------------------------------------------------
def init_params(key):
    ks = jax.random.split(key, 10)

    def xavier(k, shape, fan_in, fan_out):
        std = float(np.sqrt(2.0 / (fan_in + fan_out)))
        return std * jax.random.normal(k, shape, dtype=jnp.float32)

    p = {}
    p["Wq"] = xavier(ks[0], (IN_DIM, HD), IN_DIM, HD)
    p["Wk"] = xavier(ks[1], (IN_DIM, HD), IN_DIM, HD)
    p["Wv"] = xavier(ks[2], (IN_DIM, HD), IN_DIM, HD)
    p["We"] = xavier(ks[3], (IN_DIM, 2 * HD), IN_DIM, 2 * HD)
    p["bq"] = 0.05 * jax.random.normal(ks[4], (HD,), dtype=jnp.float32)
    p["bk"] = 0.05 * jax.random.normal(ks[5], (HD,), dtype=jnp.float32)  # use_bias=True
    p["bv"] = 0.05 * jax.random.normal(ks[6], (HD,), dtype=jnp.float32)  # use_bias=True
    p["be"] = 0.05 * jax.random.normal(ks[7], (2 * HD,), dtype=jnp.float32)
    p["Aw"] = xavier(ks[8], (OUT_DIM, NUM_HEADS, 1), NUM_HEADS, OUT_DIM)
    p["VeRow"] = xavier(ks[9], (OUT_DIM, NUM_HEADS, OUT_DIM),
                        NUM_HEADS * OUT_DIM, OUT_DIM)

    # ---- kernel-side packing (one-time, on host) ---------------------------
    # Fused Q/K/V projection columns.
    wqkv = jnp.concatenate([p["Wq"], p["Wk"], p["Wv"]], axis=1)          # [IN, 3HD]
    bqkv = jnp.concatenate([p["bq"], p["bk"], p["bv"]], axis=0)          # [3HD]

    # Permute E-projection output columns so [E_w | E_b] are contiguous
    # head-major slabs (column = head*D + d) -> no in-kernel deinterleave.
    h_idx = np.repeat(np.arange(NUM_HEADS), OUT_DIM)
    d_idx = np.tile(np.arange(OUT_DIM), NUM_HEADS)
    ew_cols = h_idx * (2 * OUT_DIM) + d_idx
    eb_cols = ew_cols + OUT_DIM
    perm = np.concatenate([ew_cols, eb_cols])
    wep = p["We"][:, perm]                                               # [IN, 2HD]
    bep = p["be"][perm]                                                  # [2HD]

    # Single fused projection weight [IN, 5HD] = [Wq|Wk|Wv|E_w|E_b] and bias row.
    p["WAll"] = jnp.concatenate([wqkv, wep], axis=1)
    p["bAll"] = jnp.concatenate([bqkv, bep], axis=0).reshape(1, 5 * HD)

    # AwFull: per-head Aw column replicated across that head's D output lanes,
    # so `score @ AwFull` yields [E, HD] logits already broadcast per-head.
    # VR: block-diagonal of VeRow so einsum('nhd,dhc->nhc') is one matmul.
    # Both shipped pre-cast to bf16 (pure MXU operands).
    awfull = np.zeros((HD, HD), np.float32)
    vr = np.zeros((HD, HD), np.float32)
    aw_np = np.asarray(p["Aw"])
    ver_np = np.asarray(p["VeRow"])
    for h in range(NUM_HEADS):
        sl = slice(h * OUT_DIM, (h + 1) * OUT_DIM)
        awfull[sl, sl] = np.broadcast_to(aw_np[:, h, 0:1], (OUT_DIM, OUT_DIM))
        vr[sl, sl] = ver_np[:, h, :]
    p["AwFull"] = jnp.asarray(awfull, dtype=jnp.bfloat16)
    p["VR"] = jnp.asarray(vr, dtype=jnp.bfloat16)
    return p


# ---------------------------------------------------------------------------
if __name__ == "__main__":
    key = jax.random.PRNGKey(0)
    kx, ke, ksrc, kdst, kp = jax.random.split(key, 5)
    params = init_params(kp)

    x = jax.random.normal(kx, (N_NODES, IN_DIM), dtype=jnp.float32)
    edge_attr = jax.random.normal(ke, (N_EDGES, IN_DIM), dtype=jnp.float32)
    src = jax.random.randint(ksrc, (N_EDGES,), 0, N_NODES)
    dst = jax.random.randint(kdst, (N_EDGES,), 0, N_NODES)
    edge_index = jnp.stack([src, dst], axis=0)

    h_out, e_out = grit_forward(x, edge_attr, edge_index, params)
    jax.block_until_ready((h_out, e_out))

    h_ref, e_ref = reference_forward(x, edge_attr, edge_index, params)
    assert h_out.shape == (N_NODES, HD) and e_out.shape == (N_EDGES, HD)
    assert bool(jnp.allclose(h_out, h_ref, atol=3e-2, rtol=3e-2)), (
        "h_out mismatch, max abs diff = %f" % float(jnp.max(jnp.abs(h_out - h_ref))))
    assert bool(jnp.allclose(e_out, e_ref, atol=3e-2, rtol=3e-2)), (
        "e_out mismatch, max abs diff = %f" % float(jnp.max(jnp.abs(e_out - e_ref))))
    print("KERNEL_OK")
</pallas_src>

<mosaic_0001>
module attributes {stable_mosaic.version = 11 : i64} {
  func.func @_grit_fused_kernel(%arg0: memref<64x1xi32, #tpu.memory_space<vmem>>, %arg1: memref<1x32xi32, #tpu.memory_space<vmem>>, %arg2: memref<16x32xf32, #tpu.memory_space<vmem>>, %arg3: memref<32x32xf32, #tpu.memory_space<vmem>>, %arg4: memref<32x160xf32, #tpu.memory_space<vmem>>, %arg5: memref<1x160xf32, #tpu.memory_space<vmem>>, %arg6: memref<32x32xbf16, #tpu.memory_space<vmem>>, %arg7: memref<32x32xbf16, #tpu.memory_space<vmem>>, %arg8: memref<16x128xf32, #tpu.memory_space<vmem>>, %arg9: memref<32x128xf32, #tpu.memory_space<vmem>>) attributes {dimension_semantics = [], scalar_prefetch = 0 : i64, scratch_operands = 0 : i64, tpu.core_type = #tpu.core_type<tc>} {
    %c0 = arith.constant 0 : index
    %c0_0 = arith.constant 0 : index
    %0 = vector.load %arg2[%c0, %c0_0] : memref<16x32xf32, #tpu.memory_space<vmem>>, vector<16x32xf32>
    %c0_1 = arith.constant 0 : index
    %c0_2 = arith.constant 0 : index
    %1 = vector.load %arg3[%c0_1, %c0_2] : memref<32x32xf32, #tpu.memory_space<vmem>>, vector<32x32xf32>
    %2 = tpu.concatenate %0, %1 in 0 : vector<16x32xf32>, vector<32x32xf32> -> vector<48x32xf32>
    %c0_3 = arith.constant 0 : index
    %c0_4 = arith.constant 0 : index
    %3 = vector.load %arg4[%c0_3, %c0_4] : memref<32x160xf32, #tpu.memory_space<vmem>>, vector<32x160xf32>
    %cst = arith.constant dense<0.000000e+00> : vector<48x160xf32>
    %4 = tpu.matmul %2, %3, %cst {dimension_numbers = #tpu.dot_dimension_numbers<[1], [0], [0], [1], [0, 0, 1, 1], [], []>} : vector<48x32xf32>, vector<32x160xf32>, vector<48x160xf32> -> vector<48x160xf32>
    %c0_5 = arith.constant 0 : index
    %c0_6 = arith.constant 0 : index
    %5 = vector.load %arg5[%c0_5, %c0_6] : memref<1x160xf32, #tpu.memory_space<vmem>>, vector<1x160xf32>
    %6 = vector.broadcast %5 : vector<1x160xf32> to vector<48x160xf32>
    %7 = arith.addf %4, %6 : vector<48x160xf32>
    %8 = vector.extract_strided_slice %7 {offsets = [0, 0], sizes = [16, 96], strides = [1, 1]} : vector<48x160xf32> to vector<16x96xf32>
    %9 = vector.extract_strided_slice %7 {offsets = [16, 96], sizes = [32, 32], strides = [1, 1]} : vector<48x160xf32> to vector<32x32xf32>
    %10 = vector.extract_strided_slice %7 {offsets = [16, 128], sizes = [32, 32], strides = [1, 1]} : vector<48x160xf32> to vector<32x32xf32>
    %c0_7 = arith.constant 0 : index
    %c0_8 = arith.constant 0 : index
    %11 = vector.load %arg0[%c0_7, %c0_8] : memref<64x1xi32, #tpu.memory_space<vmem>>, vector<64x1xi32>
    %12 = tpu.iota {dimensions = array<i32: 1>} : vector<64x16xi32>
    %13 = vector.broadcast %11 : vector<64x1xi32> to vector<64x16xi32>
    %14 = arith.cmpi eq, %13, %12 : vector<64x16xi32>
    %cst_9 = arith.constant 1.000000e+00 : f32
    %cst_10 = arith.constant 0.000000e+00 : f32
    %15 = vector.broadcast %cst_9 : f32 to vector<64x16xf32>
    %16 = vector.broadcast %cst_10 : f32 to vector<64x16xf32>
    %17 = arith.select %14, %15, %16 : vector<64x16xi1>, vector<64x16xf32>
    %18 = tpu.iota {dimensions = array<i32: 0>} : vector<16x32xi32>
    %c0_11 = arith.constant 0 : index
    %c0_12 = arith.constant 0 : index
    %19 = vector.load %arg1[%c0_11, %c0_12] : memref<1x32xi32, #tpu.memory_space<vmem>>, vector<1x32xi32>
    %20 = vector.broadcast %19 : vector<1x32xi32> to vector<16x32xi32>
    %21 = arith.cmpi eq, %18, %20 : vector<16x32xi32>
    %cst_13 = arith.constant 1.000000e+00 : f32
    %cst_14 = arith.constant 0.000000e+00 : f32
    %22 = vector.broadcast %cst_13 : f32 to vector<16x32xf32>
    %23 = vector.broadcast %cst_14 : f32 to vector<16x32xf32>
    %24 = arith.select %21, %22, %23 : vector<16x32xi1>, vector<16x32xf32>
    %25 = arith.truncf %17 : vector<64x16xf32> to vector<64x16xbf16>
    %26 = arith.truncf %8 : vector<16x96xf32> to vector<16x96xbf16>
    %cst_15 = arith.constant dense<0.000000e+00> : vector<64x96xf32>
    %27 = tpu.matmul %25, %26, %cst_15 {dimension_numbers = #tpu.dot_dimension_numbers<[1], [0], [0], [1], [0, 0, 1, 1], [], []>} : vector<64x16xbf16>, vector<16x96xbf16>, vector<64x96xf32> -> vector<64x96xf32>
    %28 = vector.extract_strided_slice %27 {offsets = [0, 32], sizes = [32, 32], strides = [1, 1]} : vector<64x96xf32> to vector<32x32xf32>
    %29 = vector.extract_strided_slice %27 {offsets = [0, 64], sizes = [32, 32], strides = [1, 1]} : vector<64x96xf32> to vector<32x32xf32>
    %30 = vector.extract_strided_slice %27 {offsets = [32, 0], sizes = [32, 32], strides = [1, 1]} : vector<64x96xf32> to vector<32x32xf32>
    %31 = arith.addf %28, %30 : vector<32x32xf32>
    %32 = arith.mulf %31, %9 : vector<32x32xf32>
    %33 = math.absf %32 : vector<32x32xf32>
    %34 = math.sqrt %33 : vector<32x32xf32>
    %cst_16 = arith.constant 0.000000e+00 : f32
    %35 = vector.broadcast %cst_16 : f32 to vector<32x32xf32>
    %36 = arith.cmpf oge, %32, %35 : vector<32x32xf32>
    %cst_17 = arith.constant 0.000000e+00 : f32
    %37 = vector.broadcast %cst_17 : f32 to vector<32x32xf32>
    %38 = arith.subf %37, %34 : vector<32x32xf32>
    %39 = arith.select %36, %34, %38 : vector<32x32xi1>, vector<32x32xf32>
    %40 = arith.addf %39, %10 : vector<32x32xf32>
    %cst_18 = arith.constant 0.000000e+00 : f32
    %41 = vector.broadcast %cst_18 : f32 to vector<32x96xf32>
    %42 = tpu.concatenate %40, %41 in 1 : vector<32x32xf32>, vector<32x96xf32> -> vector<32x128xf32>
    %c0_19 = arith.constant 0 : index
    %c0_20 = arith.constant 0 : index
    %43 = vector.load %arg9[%c0_19, %c0_20] : memref<32x128xf32, #tpu.memory_space<vmem>>, vector<32x128xf32>
    tpu.vector_store %arg9[%c0_19, %c0_20], %42 {strides = array<i32>} : memref<32x128xf32, #tpu.memory_space<vmem>>, vector<32x128xf32>,
    %44 = arith.truncf %40 : vector<32x32xf32> to vector<32x32xbf16>
    %c0_21 = arith.constant 0 : index
    %c0_22 = arith.constant 0 : index
    %45 = vector.load %arg6[%c0_21, %c0_22] : memref<32x32xbf16, #tpu.memory_space<vmem>>, vector<32x32xbf16>
    %cst_23 = arith.constant dense<0.000000e+00> : vector<32x32xf32>
    %46 = tpu.matmul %44, %45, %cst_23 {dimension_numbers = #tpu.dot_dimension_numbers<[1], [0], [0], [1], [0, 0, 1, 1], [], []>} : vector<32x32xbf16>, vector<32x32xbf16>, vector<32x32xf32> -> vector<32x32xf32>
    %cst_24 = arith.constant -5.000000e+00 : f32
    %cst_25 = arith.constant 5.000000e+00 : f32
    %47 = vector.broadcast %cst_24 : f32 to vector<32x32xf32>
    %48 = arith.maximumf %47, %46 : vector<32x32xf32>
    %49 = vector.broadcast %cst_25 : f32 to vector<32x32xf32>
    %50 = arith.minimumf %49, %48 : vector<32x32xf32>
    %51 = math.exp %50 : vector<32x32xf32>
    %cst_26 = arith.constant dense<0.000000e+00> : vector<16x32xf32>
    %52 = tpu.matmul %24, %51, %cst_26 {dimension_numbers = #tpu.dot_dimension_numbers<[1], [0], [0], [1], [0, 0, 1, 1], [], []>} : vector<16x32xf32>, vector<32x32xf32>, vector<16x32xf32> -> vector<16x32xf32>
    %53 = vector.extract_strided_slice %17 {offsets = [32, 0], sizes = [32, 16], strides = [1, 1]} : vector<64x16xf32> to vector<32x16xf32>
    %cst_27 = arith.constant dense<0.000000e+00> : vector<32x32xf32>
    %54 = tpu.matmul %53, %52, %cst_27 {dimension_numbers = #tpu.dot_dimension_numbers<[1], [0], [0], [1], [0, 0, 1, 1], [], []>} : vector<32x16xf32>, vector<16x32xf32>, vector<32x32xf32> -> vector<32x32xf32>
    %cst_28 = arith.constant 1.000000e-16 : f32
    %55 = vector.broadcast %cst_28 : f32 to vector<32x32xf32>
    %56 = arith.addf %54, %55 : vector<32x32xf32>
    %57 = tpu.reciprocal %56 {approx = true} : vector<32x32xf32> -> vector<32x32xf32>
    %58 = arith.mulf %51, %57 : vector<32x32xf32>
    %59 = arith.mulf %29, %58 : vector<32x32xf32>
    %60 = arith.mulf %40, %58 : vector<32x32xf32>
    %61 = tpu.concatenate %59, %60 in 1 : vector<32x32xf32>, vector<32x32xf32> -> vector<32x64xf32>
    %cst_29 = arith.constant dense<0.000000e+00> : vector<16x64xf32>
    %62 = tpu.matmul %24, %61, %cst_29 {dimension_numbers = #tpu.dot_dimension_numbers<[1], [0], [0], [1], [0, 0, 1, 1], [], []>} : vector<16x32xf32>, vector<32x64xf32>, vector<16x64xf32> -> vector<16x64xf32>
    %63 = vector.extract_strided_slice %62 {offsets = [0, 32], sizes = [16, 32], strides = [1, 1]} : vector<16x64xf32> to vector<16x32xf32>
    %64 = arith.truncf %63 : vector<16x32xf32> to vector<16x32xbf16>
    %c0_30 = arith.constant 0 : index
    %c0_31 = arith.constant 0 : index
    %65 = vector.load %arg7[%c0_30, %c0_31] : memref<32x32xbf16, #tpu.memory_space<vmem>>, vector<32x32xbf16>
    %cst_32 = arith.constant dense<0.000000e+00> : vector<16x32xf32>
    %66 = tpu.matmul %64, %65, %cst_32 {dimension_numbers = #tpu.dot_dimension_numbers<[1], [0], [0], [1], [0, 0, 1, 1], [], []>} : vector<16x32xbf16>, vector<32x32xbf16>, vector<16x32xf32> -> vector<16x32xf32>
    %67 = vector.extract_strided_slice %62 {offsets = [0, 0], sizes = [16, 32], strides = [1, 1]} : vector<16x64xf32> to vector<16x32xf32>
    %68 = arith.addf %67, %66 : vector<16x32xf32>
    %cst_33 = arith.constant 0.000000e+00 : f32
    %69 = vector.broadcast %cst_33 : f32 to vector<16x96xf32>
    %70 = tpu.concatenate %68, %69 in 1 : vector<16x32xf32>, vector<16x96xf32> -> vector<16x128xf32>
    %c0_34 = arith.constant 0 : index
    %c0_35 = arith.constant 0 : index
    %71 = vector.load %arg8[%c0_34, %c0_35] : memref<16x128xf32, #tpu.memory_space<vmem>>, vector<16x128xf32>
    tpu.vector_store %arg8[%c0_34, %c0_35], %70 {strides = array<i32>} : memref<16x128xf32, #tpu.memory_space<vmem>>, vector<16x128xf32>,
    return
  }
}

</mosaic_0001>

<bundles_post_ra>
// kernel: tpu_custom_call.1
= control target key start
LH: loop header
LB: loop body
LE: loop exit
PB: predicated region body
PF: predicated region fallthrough
CT: control target
= control target key end

     0   :  { %15 = vsyncpa [#allocation3], 0  ;;  %s1341_s0 = inlined_call_operand.vmem [shape: s32[64,1], index: 0, kind: input, shape index: {}]   ;;  %s1342_s1 = inlined_call_operand.vmem [shape: s32[1,32], index: 1, kind: input, shape index: {}]   ;;  %s1343_s2 = inlined_call_operand.hbm [shape: f32[16,32], index: 2, kind: input, shape index: {}]   ;;  %s1344_s3 = inlined_call_operand.hbm [shape: f32[32,32], index: 3, kind: input, shape index: {}]   ;;  %s1345_s4 = inlined_call_operand.vmem [shape: f32[32,160], index: 4, kind: input, shape index: {}]   ;;  %s1346_s5 = inlined_call_operand.vmem [shape: f32[1,160], index: 5, kind: input, shape index: {}]   ;;  %s1347_s6 = inlined_call_operand.hbm [shape: bf16[32,32], index: 6, kind: input, shape index: {}]   ;;  %s1348_s7 = inlined_call_operand.hbm [shape: bf16[32,32], index: 7, kind: input, shape index: {}]   ;;  %s1349_s8 = inlined_call_operand.hbm [shape: f32[16,128], index: 8, kind: output, shape index: {0}]   ;;  %s1350_s9 = inlined_call_operand.hbm [shape: f32[32,128], index: 9, kind: output, shape index: {1}]  }
   0x1   :  { %16 = vsyncpa [#allocation6], 0 }
   0x2   :  { %17 = vsyncpa [#allocation9], 0 }
   0x3   :  { %18 = vsyncpa [#allocation4], 0 }
   0x4   :  { %19 = vsyncpa [#allocation12], 0  ;;  %s41_s11 = sshll.u32 %s1344_s3, 4  ;;  %s1023_s12 = smov [#allocation5]   ;;  %s42_s11 = int_to_ptr.hbm [resolvable:$true] %s41_s11 }
   0x5   :  { %s43_s13 = sshll.u32 %s1023_s12, 4  ;;  %s28_s16 = sshll.u32 %s1343_s2, 4  ;;  %s44_s13 = int_to_ptr.vmem [resolvable:$true] %s43_s13  ;;  %s29_s16 = int_to_ptr.hbm [resolvable:$true] %s28_s16 }
   0x6   :  { %s1024_s17 = smov 128   ;;  %s1025_s18 = smov 8  }
   0x7   :  { %49 = dma.hbm_to_vmem [thread:$0]  %s42_s11, 512, %s44_s13, [#allocation6], %s1024_s17, %s1024_s17, %s1025_s18  }
   0x8   :  { %s1026_s19 = smov [#allocation2]   ;;  %s58_s3 = sshll.u32 %s1347_s6, 4  ;;  %s59_s3 = int_to_ptr.hbm [resolvable:$true] %s58_s3 }
   0x9   :  { %s30_s20 = sshll.u32 %s1026_s19, 4  ;;  %s1027_s2 = smov [#allocation7]   ;;  %s31_s20 = int_to_ptr.vmem [resolvable:$true] %s30_s20 }
   0xa   :  { %36 = dma.hbm_to_vmem [thread:$0]  %s29_s16, 256, %s31_s20, [#allocation3], %s1024_s17, %s1024_s17, %s1025_s18  }
   0xb   :  { %s60_s23 = sshll.u32 %s1027_s2, 4  ;;  %s71_s26 = sshll.u32 %s1348_s7, 4  ;;  %s61_s23 = int_to_ptr.vmem [resolvable:$true] %s60_s23  ;;  %s72_s26 = int_to_ptr.hbm [resolvable:$true] %s71_s26 }
   0xc   :  { %s1028_s27 = smov 64   ;;  %s1029_s28 = smov 4  }
   0xd   :  { %66 = dma.hbm_to_vmem [thread:$0]  %s59_s3, 256, %s61_s23, [#allocation6], %s1028_s27, %s1028_s27, %s1029_s28  }
   0xe   :  { %s1030_s6 = smov [#allocation8]  }
   0xf   :  { %s73_s29 = sshll.u32 %s1030_s6, 4  ;;  %s74_s29 = int_to_ptr.vmem [resolvable:$true] %s73_s29 }
  0x10   :  { %79 = dma.hbm_to_vmem [thread:$0]  %s72_s26, 256, %s74_s29, [#allocation9], %s1028_s27, %s1028_s27, %s1029_s28  }
  0x11   :  { %1013 = dma.done.wait [#allocation3], 256  }
  0x12   :  { %1014 = vsyncadd [#allocation3], 4294967040 }
  0x13   :  { %1015 = dma.done.wait [#allocation6], 768  }
  0x14   :  { %1016 = vsyncadd [#allocation6], 4294966528 }
  0x15   :  { %1017 = dma.done.wait [#allocation9], 256  }
  0x16   :  { %1018 = vsyncadd [#allocation9], 4294967040  ;;  %v1031_v0 = vmov 0   ;;  %v109_v1 = vld [vmem:[%s1345_s4 + $0x30] sm:$0xff]  ;;  %v107_v2 = vld [vmem:[%s1345_s4 + $0x20] sm:$0xff]  ;;  %vm117_vm0 = vcmask 261120   ;;  %v212_v18 = vlaneseq }
  0x17   :  { %832 = vset.pattern.permute.xlu1 %v1031_v0  ;;  %831 = vset.pattern.permute.xlu0 %v1031_v0  ;;  %v206_v3 = vld [vmem:[%s1341_s0 + $0x10] sm:$0xff]  ;;  %v204_v4 = vld [vmem:[%s1341_s0] sm:$0xff]  ;;  %v207_v9 = vld [vmem:[%s1341_s0 + $0x18] sm:$0xff]  ;;  %v1032_v27 = vmov 0.0   ;;  %vm268_vm3 = vcmask 130048   ;;  %s1034_s20 = smov 96  }
  0x18   :  { %833 = vset.pattern.permute.xlu2 %v1031_v0  ;;  %148 = vmatpush.msra.mxu0 %v109_v1  ;;  %v105_v5 = vld [vmem:[%s1345_s4 + $0x10] sm:$0xff]  ;;  %v103_v6 = vld [vmem:[%s1345_s4] sm:$0xff]  ;;  %v205_v10 = vld [vmem:[%s1341_s0 + $0x8] sm:$0xff]  ;;  %v213_v21 = vand.u32 127, %v212_v18  ;;  %s742_s23 = sshll.u32 %s1350_s9, 4  ;;  %s1036_s24 = smov [#allocation10]   ;;  %s743_s23 = int_to_ptr.hbm [resolvable:$true] %s742_s23 }
  0x19   :  { %813 = vmatpush.msra.mxu2 %v109_v1  ;;  %221 = vperm.xlu1 %832, %v206_v3   ;;  %v208_v7 = vld [vmem:[%s1341_s0 + $0x20] sm:$0xff]  ;;  %v209_v11 = vld [vmem:[%s1341_s0 + $0x28] sm:$0xff]  ;;  %v211_v13 = vld [vmem:[%s1341_s0 + $0x38] sm:$0xff]  ;;  %s727_s25 = sshll.u32 %s1036_s24, 4  ;;  %s729_s6 = sshll.u32 %s1349_s8, 4  ;;  %s728_s25 = int_to_ptr.vmem [resolvable:$true] %s727_s25  ;;  %s730_s6 = int_to_ptr.hbm [resolvable:$true] %s729_s6 }
  0x1a   :  { %215 = vperm.xlu0 %831, %v204_v4   ;;  %149 = vmatpush.msra.mxu0 %v107_v2  ;;  %v97_v8 = vld [vmem:[#allocation2] sm:$0xff]  ;;  %v98_v12 = vld [vmem:[#allocation2 + $0x8] sm:$0xff]  ;;  %v210_v14 = vld [vmem:[%s1341_s0 + $0x30] sm:$0xff] }
  0x1b   :  { %814 = vmatpush.msra.mxu2 %v107_v2  ;;  %227 = vperm.xlu2 %833, %v208_v7   ;;  %v1147_v15 = vld [vmem:[#allocation5 + $0x18] sm:$0xff]  ;;  %v99_v16 = vld [vmem:[#allocation5] sm:$0xff]  ;;  %v1155_v20 = vld [vmem:[%s1346_s5] sm:$0x3] }
  0x1c   :  { %150 = vmatpush.msra.mxu0 %v105_v5  ;;  %v1159_v22 = vperm.slane %v1155_v20, 0  ;;  %v110_v33 = vld [vmem:[%s1345_s4 + $0x38] sm:$0xff]  ;;  %v108_v34 = vld [vmem:[%s1345_s4 + $0x28] sm:$0xff]  ;;  %v101_v44 = vld [vmem:[#allocation5 + $0x10] sm:$0xff]  ;;  %v114_v7 = vperm.slane %v1155_v20, 1 }
  0x1d   :  { %815 = vmatpush.msra.mxu2 %v105_v5  ;;  %183 = vmatpush.msra.mxu1 %v110_v33  ;;  %v106_v35 = vld [vmem:[%s1345_s4 + $0x18] sm:$0xff]  ;;  %v104_v41 = vld [vmem:[%s1345_s4 + $0x8] sm:$0xff]  ;;  %s1033_s4 = smov 32  }
  0x1e   :  { %151 = vmatpush.msra.mxu0 %v103_v6  ;;  %v100_v42 = vld [vmem:[#allocation5 + $0x8] sm:$0xff] }
  0x1f   :  { %762 = vmatmul.msk.f32.vlgmr.msra.gmra.mxu0 %vm117_vm0, %v97_v8  ;;  %816 = vmatpush.msra.mxu2 %v103_v6 }
  0x20   :  { %767 = vmatmul.msk.f32.vlgmr.msra.gmra.mxu2 %vm117_vm0, %v1147_v15  ;;  %184 = vmatpush.msra.mxu1 %v108_v34 }
  0x21   :  { %224 = vperm.xlu1 %832, %v207_v9  }
  0x22   :  { %218 = vperm.xlu0 %831, %v205_v10   ;;  %185 = vmatpush.msra.mxu1 %v106_v35 }
  0x23   :  { %230 = vperm.xlu2 %833, %v209_v11  }
  0x24   :  { %186 = vmatpush.msra.mxu1 %v104_v41 }
  0x25   :  { %768 = vmatmul.msk.f32.vlgmr.msra.gmra.mxu1 %vm117_vm0, %v97_v8 }
  0x27   :  { %763 = vmatmul.msk.f32.gmra.mxu0 %vm117_vm0, %v98_v12 }
  0x29   :  { %236 = vperm.xlu1 %832, %v211_v13  }
  0x2a   :  { %233 = vperm.xlu0 %831, %v210_v14  }
  0x2d   :  { %769 = vmatmul.msk.f32.gmra.mxu1 %vm117_vm0, %v98_v12 }
  0x2f   :  { %764 = vmatmul.msk.f32.gmra.mxu0 %vm117_vm0, %v99_v16 }
  0x35   :  { %770 = vmatmul.msk.f32.gmra.mxu1 %vm117_vm0, %v99_v16 }
  0x37   :  { %765 = vmatmul.msk.f32.gmra.mxu0 %vm117_vm0, %v100_v42 }
  0x3d   :  { %771 = vmatmul.msk.f32.gmra.mxu1 %vm117_vm0, %v100_v42 }
  0x3f   :  { %766 = vmatmul.msk.f32.gmra.mxu0 %vm117_vm0, %v101_v44 }
  0x45   :  { %772 = vmatmul.msk.f32.gmra.mxu1 %vm117_vm0, %v101_v44 }
  0x4d   :  { %773 = vmatmul.msk.f32.gmra.mxu1 %vm117_vm0, %v1147_v15 }
  0x75   :  { %v228_v39 = vpop.permute.xlu2 %227 }
  0x76   :  { %vm242_vm6 = vcmp.eq.s32.totalorder %v228_v39, %v213_v21 }
  0x77   :  { %v1186_v45 = vsel %vm242_vm6, 1.0, %v1032_v27 }
  0x7d   :  { %v231_v43 = vpop.permute.xlu2 %230 }
  0x7e   :  { %vm243_vm7 = vcmp.eq.s32.totalorder %v231_v43, %v213_v21 }
  0x7f   :  { %v1189_v46 = vsel %vm243_vm7, 1.0, %v1032_v27 }
  0x80   :  { %v265_v47 = vpack.c.bf16 %v1189_v46, %v1186_v45 }
  0x8b   :  { %v222_v31 = vpop.permute.xlu1 %221 }
  0x8c   :  { %v216_v17 = vpop.permute.xlu0 %215  ;;  %vm240_vm4 = vcmp.eq.s32.totalorder %v222_v31, %v213_v21 }
  0x8d   :  { %vm238_vm1 = vcmp.eq.s32.totalorder %v216_v17, %v213_v21  ;;  %v248_v37 = vsel %vm240_vm4, 1.0, %v1032_v27 }
  0x8e   :  { %v246_v28 = vsel %vm238_vm1, 1.0, %v1032_v27 }
  0x93   :  { %v225_v36 = vpop.permute.xlu1 %224 }
  0x94   :  { %v219_v23 = vpop.permute.xlu0 %218  ;;  %vm241_vm5 = vcmp.eq.s32.totalorder %v225_v36, %v213_v21 }
  0x95   :  { %vm239_vm2 = vcmp.eq.s32.totalorder %v219_v23, %v213_v21  ;;  %v249_v38 = vsel %vm241_vm5, 1.0, %v1032_v27 }
  0x96   :  { %v247_v29 = vsel %vm239_vm2, 1.0, %v1032_v27  ;;  %v264_v40 = vpack.c.bf16 %v249_v38, %v248_v37 }
  0x97   :  { %v263_v32 = vpack.c.bf16 %v247_v29, %v246_v28 }
  0x9b   :  { %v237_v48 = vpop.permute.xlu1 %236 }
  0x9c   :  { %v153_v19 = vpop.f32.mrf.mxu0  ;;  %v234_v49 = vpop.permute.xlu0 %233  ;;  %vm245_vm8 = vcmp.eq.s32.totalorder %v237_v48, %v213_v21 }
  0x9d   :  { %v154_v25 = vadd.f32 %v153_v19, %v1159_v22  ;;  %vm244_vm9 = vcmp.eq.s32.totalorder %v234_v49, %v213_v21  ;;  %v1197_v50 = vsel %vm245_vm8, 1.0, %v1032_v27 }
  0x9e   :  { %v1200_v51 = vsel %vm244_vm9, 1.0, %v1032_v27 }
  0x9f   :  { %v266_v52 = vpack.c.bf16 %v1197_v50, %v1200_v51 }
  0xa2   :  { %v188_v58 = vpop.f32.mrf.mxu1 }
  0xa3   :  { %v168_v55 = vpop.f32.mrf.mxu2 }
  0xa4   :  { %v156_v24 = vpop.f32.mrf.mxu0  ;;  %v169_v9 = vadd.f32 %v168_v55, %v1159_v22 }
  0xa5   :  { %v157_v26 = vadd.f32 %v156_v24, %v1159_v22 }
  0xa7   :  { %v267_v30 = vpack.c.bf16 %v157_v26, %v154_v25 }
  0xa9   :  { %288 = vmatpush.bf16.msrb.mxu2 %v267_v30 }
  0xaa   :  { %v190_v60 = vpop.f32.mrf.mxu1 }
  0xac   :  { %774 = vmatmul.msk.bf16.vlgmr.msrb.gmra.mxu2 %vm268_vm3, %v263_v32  ;;  %v159_v53 = vpop.f32.mrf.mxu0 }
  0xad   :  { %v160_v54 = vadd.f32 %v159_v53, %v1159_v22 }
  0xaf   :  { %334 = vrot.lane.b32.xlu1 %v160_v54, %s1028_s27 }
  0xb2   :  { %v192_v0 = vpop.f32.mrf.mxu1 }
  0xb3   :  { %v193_v13 = vadd.f32 %v192_v0, %v114_v7 }
  0xb4   :  { %v162_v63 = vpop.f32.mrf.mxu0 }
  0xb5   :  { %v163_v1 = vadd.f32 %v162_v63, %v1159_v22 }
  0xba   :  { %v195_v5 = vpop.f32.mrf.mxu1 }
  0xbb   :  { %v196_v8 = vadd.f32 %v195_v5, %v114_v7 }
  0xbc   :  { %775 = vmatmul.msk.bf16.gmra.mxu2 %vm268_vm3, %v264_v40  ;;  %v165_v3 = vpop.f32.mrf.mxu0 }
  0xbd   :  { %v166_v4 = vadd.f32 %v165_v3, %v1159_v22 }
  0xc2   :  { %v198_v11 = vpop.f32.mrf.mxu1 }
  0xc3   :  { %v199_v12 = vadd.f32 %v198_v11, %v114_v7 }
  0xca   :  { %v201_v14 = vpop.f32.mrf.mxu1 }
  0xcb   :  { %v202_v15 = vadd.f32 %v201_v14, %v114_v7 }
  0xcc   :  { %776 = vmatmul.msk.bf16.gmra.mxu2 %vm268_vm3, %v265_v47 }
  0xdc   :  { %777 = vmatmul.msk.bf16.gmra.mxu2 %vm268_vm3, %v266_v52  ;;  %v810_v52 = vld [vmem:[#allocation7 + $0x8] sm:$0xff] }
  0xdd   :  { %494 = vmatpush.bf16.msra.mxu3 %v810_v52 }
 0x121   :  { %v335_v19 = vpop.permute.xlu1 %334 }
 0x12f   :  { %v1210_v56 = vpop.f32.mrf.mxu2 }
 0x137   :  { %v1212_v57 = vpop.f32.mrf.mxu2 }
 0x13f   :  { %v1214_v59 = vpop.f32.mrf.mxu2 }
 0x147   :  { %v1216_v61 = vpop.f32.mrf.mxu2 }
 0x14f   :  { %v300_v62 = vpop.f32.mrf.mxu2 }
 0x150   :  { %314 = vrot.lane.b32.xlu2 %v300_v62, %s1033_s4  ;;  %v809_v62 = vld [vmem:[#allocation7] sm:$0xff] }
 0x151   :  { %495 = vmatpush.bf16.msra.mxu3 %v809_v62 }
 0x157   :  { %v302_v2 = vpop.f32.mrf.mxu2 }
 0x158   :  { %316 = vrot.lane.b32.xlu0 %v302_v2, %s1033_s4  ;;  %336 = vrot.lane.b32.xlu2 %v163_v1, %s1028_s27 }
 0x15f   :  { %v305_v6 = vpop.f32.mrf.mxu2 }
 0x160   :  { %318 = vrot.lane.b32.xlu0 %v305_v6, %s1033_s4  ;;  %338 = vrot.lane.b32.xlu2 %v166_v4, %s1028_s27 }
 0x167   :  { %v307_v10 = vpop.f32.mrf.mxu2 }
 0x168   :  { %340 = vrot.lane.b32.xlu0 %v169_v9, %s1028_s27  ;;  %320 = vrot.lane.b32.xlu1 %v307_v10, %s1033_s4 }
 0x169   :  { %420 = vrot.lane.b32.xlu2 %v196_v8, %s1033_s4 }
 0x170   :  { %418 = vrot.lane.b32.xlu1 %v193_v13, %s1033_s4  ;;  %422 = vrot.lane.b32.xlu0 %v199_v12, %s1033_s4 }
 0x178   :  { %424 = vrot.lane.b32.xlu1 %v202_v15, %s1033_s4 }
 0x1aa   :  { %v315_v16 = vpop.permute.xlu2 %314 }
 0x1ab   :  { %v326_v17 = vadd.f32 %v315_v16, %v1210_v56 }
 0x1ad   :  { %v1234_v20 = vmul.f32 %v335_v19, %v326_v17 }
 0x1af   :  { %v350_v21 = vand.u32 2147483647, %v1234_v20  ;;  %vm402_vm14 = vcmp.ge.f32.partialorder %v1234_v20, 0.0 }
 0x1b1   :  { %845 = vrsqrt.f32 %v350_v21  ;;  %vm361_vm10 = vcmp.eq.f32.partialorder %v350_v21, inf  ;;  %v364_v60 = vand.u32 2147483648, %v350_v21  ;;  %vm363_vm11 = vcmp.eq.f32.partialorder %v350_v21, 0.0 }
 0x1b2   :  { %v337_v24 = vpop.permute.xlu2 %336 }
 0x1b7   :  { %v846_v22 = vpop.eup %845 }
 0x1b8   :  { %v355_v23 = vmul.f32 %v846_v22, %v350_v21 }
 0x1ba   :  { %v356_v26 = vmul.f32 %v846_v22, %v355_v23  ;;  %v339_v35 = vpop.permute.xlu2 %338 }
 0x1bc   :  { %v357_v30 = vmul.f32 0.5, %v356_v26 }
 0x1be   :  { %v358_v33 = vsub.f32 1.5, %v357_v30 }
 0x1c0   :  { %v359_v37 = vmul.f32 %v846_v22, %v358_v33 }
 0x1c2   :  { %v360_v43 = vmul.f32 %v359_v37, %v350_v21 }
 0x1c3   :  { %v421_v13 = vpop.permute.xlu2 %420 }
 0x1c4   :  { %v362_v54 = vsel %vm361_vm10, %v350_v21, %v360_v43 }
 0x1c5   :  { %v365_v1 = vsel %vm363_vm11, %v364_v60, %v362_v54 }
 0x1c6   :  { %v406_v6 = vsub.f32 0.0, %v365_v1 }
 0x1c8   :  { %v410_v15 = vsel %vm402_vm14, %v365_v1, %v406_v6 }
 0x1ca   :  { %v317_v25 = vpop.permute.xlu0 %316 }
 0x1cb   :  { %v327_v28 = vadd.f32 %v317_v25, %v1212_v57 }
 0x1cd   :  { %v347_v29 = vmul.f32 %v337_v24, %v327_v28 }
 0x1cf   :  { %v351_v31 = vand.u32 2147483647, %v347_v29  ;;  %vm403_vm15 = vcmp.ge.f32.partialorder %v347_v29, 0.0 }
 0x1d1   :  { %847 = vrsqrt.f32 %v351_v31  ;;  %vm373_vm12 = vcmp.eq.f32.partialorder %v351_v31, inf  ;;  %v376_v4 = vand.u32 2147483648, %v351_v31  ;;  %vm375_vm13 = vcmp.eq.f32.partialorder %v351_v31, 0.0 }
 0x1d2   :  { %v319_v32 = vpop.permute.xlu0 %318 }
 0x1d3   :  { %v328_v34 = vadd.f32 %v319_v32, %v1214_v59 }
 0x1d5   :  { %v1239_v36 = vmul.f32 %v339_v35, %v328_v34 }
 0x1d7   :  { %v848_v38 = vpop.eup %847  ;;  %v352_v39 = vand.u32 2147483647, %v1239_v36  ;;  %vm404_vm6 = vcmp.ge.f32.partialorder %v1239_v36, 0.0 }
 0x1d8   :  { %v367_v40 = vmul.f32 %v848_v38, %v351_v31 }
 0x1d9   :  { %849 = vrsqrt.f32 %v352_v39  ;;  %vm385_vm1 = vcmp.eq.f32.partialorder %v352_v39, inf  ;;  %v388_v20 = vand.u32 2147483648, %v352_v39  ;;  %vm387_vm2 = vcmp.eq.f32.partialorder %v352_v39, 0.0 }
 0x1da   :  { %v368_v41 = vmul.f32 %v848_v38, %v367_v40  ;;  %v321_v42 = vpop.permute.xlu1 %320  ;;  %v341_v48 = vpop.permute.xlu0 %340 }
 0x1db   :  { %v329_v44 = vadd.f32 %v321_v42, %v1216_v61 }
 0x1dc   :  { %v369_v47 = vmul.f32 0.5, %v368_v41 }
 0x1dd   :  { %v1243_v49 = vmul.f32 %v341_v48, %v329_v44 }
 0x1de   :  { %v370_v53 = vsub.f32 1.5, %v369_v47 }
 0x1df   :  { %v850_v55 = vpop.eup %849  ;;  %v353_v58 = vand.u32 2147483647, %v1243_v49  ;;  %vm405_vm7 = vcmp.ge.f32.partialorder %v1243_v49, 0.0 }
 0x1e0   :  { %v371_v63 = vmul.f32 %v848_v38, %v370_v53  ;;  %v379_v0 = vmul.f32 %v850_v55, %v352_v39 }
 0x1e1   :  { %851 = vrsqrt.f32 %v353_v58  ;;  %vm397_vm4 = vcmp.eq.f32.partialorder %v353_v58, inf  ;;  %v400_v33 = vand.u32 2147483648, %v353_v58  ;;  %vm399_vm5 = vcmp.eq.f32.partialorder %v353_v58, 0.0 }
 0x1e2   :  { %v372_v2 = vmul.f32 %v371_v63, %v351_v31  ;;  %v380_v3 = vmul.f32 %v850_v55, %v379_v0  ;;  %v419_v10 = vpop.permute.xlu1 %418  ;;  %v423_v38 = vpop.permute.xlu0 %422 }
 0x1e3   :  { %v1249_v21 = vadd.f32 %v419_v10, %v410_v15 }
 0x1e4   :  { %v374_v5 = vsel %vm373_vm12, %v351_v31, %v372_v2  ;;  %v381_v7 = vmul.f32 0.5, %v380_v3  ;;  %v255_v2 = vshrl.u32 %v212_v18, 7  ;;  %v844_v3 = vld [vmem:[%s1342_s1] ss:$0 sm:$0xff]  ;;  %s1035_s1 = smov [#allocation11]  }
 0x1e5   :  { %v377_v8 = vsel %vm375_vm13, %v376_v4, %v374_v5 }
 0x1e6   :  { %v407_v9 = vsub.f32 0.0, %v377_v8  ;;  %v382_v11 = vsub.f32 1.5, %v381_v7  ;;  %vm259_vm8 = vcmp.eq.s32.totalorder %v255_v2, %v844_v3 }
 0x1e7   :  { %v852_v12 = vpop.eup %851  ;;  %v1270_v7 = vsel %vm259_vm8, 1.0, %v1032_v27 }
 0x1e8   :  { %v411_v14 = vsel %vm403_vm15, %v377_v8, %v407_v9  ;;  %v383_v16 = vmul.f32 %v850_v55, %v382_v11  ;;  %v391_v17 = vmul.f32 %v852_v12, %v353_v58  ;;  %v256_v9 = vadd.s32 8, %v255_v2  ;;  %v811_v2 = vld [vmem:[#allocation8] sm:$0xff] }
 0x1e9   :  { %v1247_v19 = vadd.f32 %v421_v13, %v411_v14 }
 0x1ea   :  { %v384_v22 = vmul.f32 %v383_v16, %v352_v39  ;;  %v392_v23 = vmul.f32 %v852_v12, %v391_v17  ;;  %v425_v41 = vpop.permute.xlu1 %424  ;;  %vm260_vm9 = vcmp.eq.s32.totalorder %v256_v9, %v844_v3 }
 0x1eb   :  { %v458_v24 = vpack.c.bf16 %v1247_v19, %v1249_v21  ;;  %v1275_v18 = vsel %vm260_vm9, 1.0, %v1032_v27 }
 0x1ec   :  { %v386_v25 = vsel %vm385_vm1, %v352_v39, %v384_v22  ;;  %v393_v26 = vmul.f32 0.5, %v392_v23 }
 0x1ed   :  { %466 = vrot.lane.b32.xlu2 %v458_v24, %s1034_s20  ;;  %v389_v29 = vsel %vm387_vm2, %v388_v20, %v386_v25 }
 0x1ee   :  { %v394_v28 = vsub.f32 1.5, %v393_v26  ;;  %v408_v31 = vsub.f32 0.0, %v389_v29 }
 0x1f0   :  { %v395_v30 = vmul.f32 %v852_v12, %v394_v28  ;;  %v412_v37 = vsel %vm404_vm6, %v389_v29, %v408_v31 }
 0x1f1   :  { %v1256_v39 = vadd.f32 %v423_v38, %v412_v37 }
 0x1f2   :  { %v396_v32 = vmul.f32 %v395_v30, %v353_v58 }
 0x1f4   :  { %v398_v34 = vsel %vm397_vm4, %v353_v58, %v396_v32 }
 0x1f5   :  { %v401_v35 = vsel %vm399_vm5, %v400_v33, %v398_v34 }
 0x1f6   :  { %v409_v40 = vsub.f32 0.0, %v401_v35 }
 0x1f8   :  { %v413_v42 = vsel %vm405_vm7, %v401_v35, %v409_v40 }
 0x1f9   :  { %v1258_v43 = vadd.f32 %v425_v41, %v413_v42 }
 0x1fb   :  { %v459_v44 = vpack.c.bf16 %v1258_v43, %v1256_v39 }
 0x1fd   :  { %468 = vrot.lane.b32.xlu0 %v459_v44, %s1034_s20 }
 0x247   :  { %v467_v47 = vpop.permute.xlu2 %466 }
 0x248   :  { %786 = vmatmul.msk.bf16.vlgmr.msra.gmra.mxu3 %vm117_vm0, %v467_v47 }
 0x26f   :  { %v469_v36 = vpop.permute.xlu0 %468 }
 0x270   :  { %787 = vmatmul.msk.bf16.gmra.mxu3 %vm117_vm0, %v469_v36 }
 0x2cb   :  { %v497_v48 = vpop.f32.mrf.mxu3 }
 0x2cc   :  { %v788_v60 = vclamps-f32 %v497_v48, 5.0 }
 0x2ce   :  { %v515_v1 = vmul.f32 1.442695, %v788_v60 }
 0x2d3   :  { %v499_v52 = vpop.f32.mrf.mxu3 }
 0x2d4   :  { %v789_v55 = vclamps-f32 %v499_v52, 5.0 }
 0x2d6   :  { %v517_v0 = vmul.f32 1.442695, %v789_v55 }
 0x2f3   :  { %v502_v53 = vpop.f32.mrf.mxu3 }
 0x2f4   :  { %v790_v49 = vclamps-f32 %v502_v53, 5.0 }
 0x2f6   :  { %v519_v62 = vmul.f32 1.442695, %v790_v49 }
 0x2fb   :  { %v504_v54 = vpop.f32.mrf.mxu3 }
 0x2fc   :  { %v791_v58 = vclamps-f32 %v504_v54, 5.0 }
 0x2fe   :  { %v521_v63 = vmul.f32 1.442695, %v791_v58 }
 0x300   :  { %853 = vpow2.f32 %v521_v63 }
 0x301   :  { %855 = vpow2.f32 %v519_v62 }
 0x302   :  { %857 = vpow2.f32 %v517_v0 }
 0x303   :  { %859 = vpow2.f32 %v515_v1 }
 0x306   :  { %v854_v4 = vpop.eup %853 }
 0x307   :  { %541 = vmatpush.msrb.mxu3 %v854_v4  ;;  %v856_v5 = vpop.eup %855 }
 0x308   :  { %v858_v6 = vpop.eup %857 }
 0x309   :  { %542 = vmatpush.msrb.mxu3 %v856_v5  ;;  %v860_v8 = vpop.eup %859 }
 0x30b   :  { %543 = vmatpush.msrb.mxu3 %v858_v6 }
 0x30d   :  { %544 = vmatpush.msrb.mxu3 %v860_v8 }
 0x30e   :  { %792 = vmatmul.msk.f32.vlgmr.msrb.gmra.mxu3 %vm117_vm0, %v1270_v7 }
 0x316   :  { %793 = vmatmul.msk.f32.gmra.mxu3 %vm117_vm0, %v1275_v18 }
 0x391   :  { %v546_v10 = vpop.f32.mrf.mxu3 }
 0x399   :  { %v549_v11 = vpop.f32.mrf.mxu3 }
 0x39a   :  { %578 = vmatpush.msrb.mxu0 %v549_v11 }
 0x39c   :  { %579 = vmatpush.msrb.mxu0 %v546_v10 }
 0x39d   :  { %794 = vmatmul.msk.f32.vlgmr.msrb.gmra.mxu0 %vm268_vm3, %v1186_v45 }
 0x3a5   :  { %795 = vmatmul.msk.f32.gmra.mxu0 %vm268_vm3, %v1189_v46 }
 0x3ad   :  { %796 = vmatmul.msk.f32.gmra.mxu0 %vm268_vm3, %v1200_v51 }
 0x3b5   :  { %797 = vmatmul.msk.f32.gmra.mxu0 %vm268_vm3, %v1197_v50 }
 0x41a   :  { %v581_v27 = vpop.f32.mrf.mxu0 }
 0x41b   :  { %v582_v45 = vadd.f32 1e-16, %v581_v27 }
 0x422   :  { %v584_v12 = vpop.f32.mrf.mxu0 }
 0x423   :  { %v585_v13 = vadd.f32 1e-16, %v584_v12 }
 0x425   :  { %861 = vrcp.f32 %v585_v13 }
 0x42a   :  { %v587_v14 = vpop.f32.mrf.mxu0 }
 0x42b   :  { %v862_v15 = vpop.eup %861  ;;  %v588_v16 = vadd.f32 1e-16, %v587_v14 }
 0x42c   :  { %v598_v17 = vmul.f32 %v862_v15, %v858_v6 }
 0x42d   :  { %863 = vrcp.f32 %v588_v16 }
 0x42e   :  { %607 = vrot.lane.b32.xlu0 %v598_v17, %s1028_s27  ;;  %865 = vrcp.f32 %v582_v45 }
 0x432   :  { %v590_v22 = vpop.f32.mrf.mxu0 }
 0x433   :  { %v864_v46 = vpop.eup %863  ;;  %v591_v23 = vadd.f32 1e-16, %v590_v22 }
 0x434   :  { %v599_v51 = vmul.f32 %v864_v46, %v856_v5  ;;  %v866_v50 = vpop.eup %865 }
 0x435   :  { %867 = vrcp.f32 %v591_v23  ;;  %v597_v26 = vmul.f32 %v866_v50, %v860_v8 }
 0x436   :  { %609 = vrot.lane.b32.xlu2 %v599_v51, %s1028_s27  ;;  %625 = vrot.lane.b32.xlu0 %v599_v51, %s1033_s4 }
 0x43b   :  { %v868_v24 = vpop.eup %867 }
 0x43c   :  { %v600_v25 = vmul.f32 %v868_v24, %v854_v4 }
 0x43e   :  { %611 = vrot.lane.b32.xlu1 %v600_v25, %s1028_s27  ;;  %627 = vrot.lane.b32.xlu2 %v600_v25, %s1033_s4 }
 0x43f   :  { %621 = vrot.lane.b32.xlu0 %v597_v26, %s1033_s4 }
 0x446   :  { %623 = vrot.lane.b32.xlu2 %v598_v17, %s1033_s4  ;;  %605 = vrot.lane.b32.xlu1 %v597_v26, %s1028_s27 }
 0x447   :  { %438 = vrot.lane.b32.xlu0 %v1249_v21, %s1034_s20 }
 0x44f   :  { %444 = vrot.lane.b32.xlu0 %v1258_v43, %s1034_s20 }
 0x490   :  { %v610_v29 = vpop.permute.xlu2 %609 }
 0x491   :  { %v619_v31 = vmul.f32 %v610_v29, %v1214_v59 }
 0x4a0   :  { %v608_v20 = vpop.permute.xlu0 %607 }
 0x4a1   :  { %v618_v37 = vmul.f32 %v608_v20, %v1212_v57 }
 0x4a8   :  { %v626_v28 = vpop.permute.xlu0 %625 }
 0x4b0   :  { %v612_v30 = vpop.permute.xlu1 %611 }
 0x4b1   :  { %v620_v32 = vmul.f32 %v612_v30, %v1216_v61  ;;  %v622_v33 = vpop.permute.xlu0 %621  ;;  %v628_v61 = vpop.permute.xlu2 %627 }
 0x4b2   :  { %v636_v57 = vmul.f32 %v628_v61, %v1258_v43  ;;  %v633_v62 = vmul.f32 %v622_v33, %v1249_v21 }
 0x4b3   :  { %v834_v34 = vpack.i.bf16 %v619_v31, %v620_v32 }
 0x4b5   :  { %835 = vrot.lane.b32.xlu1 %v834_v34, %s1028_s27 }
 0x4b8   :  { %v606_v35 = vpop.permute.xlu1 %605 }
 0x4b9   :  { %v439_v38 = vpop.permute.xlu0 %438  ;;  %v617_v40 = vmul.f32 %v606_v35, %v1210_v56  ;;  %v635_v56 = vmul.f32 %v626_v28, %v1256_v39  ;;  %v624_v49 = vpop.permute.xlu2 %623 }
 0x4ba   :  { %v450_v41 = vsel %vm117_vm0, %v439_v38, 0.0  ;;  %v634_v55 = vmul.f32 %v624_v49, %v1247_v19 }
 0x4bb   :  { %454 = vst [vmem:[#allocation11] sm:$0xff] %v450_v41  ;;  %v839_v42 = vpack.i.bf16 %v617_v40, %v618_v37 }
 0x4bd   :  { %840 = vrot.lane.b32.xlu1 %v839_v42, %s1028_s27  ;;  %s740_s27 = sshll.u32 %s1035_s1, 4  ;;  %s741_s27 = int_to_ptr.vmem [resolvable:$true] %s740_s27 }
 0x4c1   :  { %v445_v44 = vpop.permute.xlu0 %444 }
 0x4c2   :  { %v453_v59 = vsel %vm117_vm0, %v445_v44, 0.0 }
 0x4c3   :  { %457 = vst [vmem:[#allocation11 + $0x18] sm:$0xff] %v453_v59 }
 0x4c5   :  { %440 = vrot.lane.b32.xlu1 %v1247_v19, %s1034_s20  ;;  %v812_v19 = vld [vmem:[#allocation8 + $0x8] sm:$0xff] }
 0x4c6   :  { %709 = vmatpush.bf16.msra.mxu3 %v812_v19 }
 0x4ca   :  { %710 = vmatpush.bf16.msra.mxu3 %v811_v2 }
 0x527   :  { %v836_v47 = vpop.permute.xlu1 %835 }
 0x528   :  { %v838_v36 = vunpack.i.h.bf16 %v836_v47  ;;  %v837_v48 = vunpack.i.l.bf16 %v836_v47 }
 0x52a   :  { %v656_v52 = vsel %vm117_vm0, %v837_v48, %v636_v57  ;;  %v655_v53 = vsel %vm117_vm0, %v838_v36, %v635_v56 }
 0x52b   :  { %669 = vmatpush.msrb.mxu1 %v656_v52 }
 0x52d   :  { %670 = vmatpush.msrb.mxu1 %v655_v53 }
 0x52f   :  { %v841_v54 = vpop.permute.xlu1 %840 }
 0x530   :  { %v843_v58 = vunpack.i.h.bf16 %v841_v54  ;;  %v842_v60 = vunpack.i.l.bf16 %v841_v54 }
 0x532   :  { %v654_v43 = vsel %vm117_vm0, %v842_v60, %v634_v55  ;;  %v653_v63 = vsel %vm117_vm0, %v843_v58, %v633_v62 }
 0x533   :  { %671 = vmatpush.msrb.mxu1 %v654_v43 }
 0x535   :  { %672 = vmatpush.msrb.mxu1 %v653_v63 }
 0x536   :  { %798 = vmatmul.msk.f32.vlgmr.msrb.gmra.mxu1 %vm117_vm0, %v1270_v7 }
 0x537   :  { %v441_v0 = vpop.permute.xlu1 %440 }
 0x538   :  { %v451_v1 = vsel %vm117_vm0, %v441_v0, 0.0 }
 0x539   :  { %455 = vst [vmem:[#allocation11 + $0x8] sm:$0xff] %v451_v1 }
 0x53e   :  { %799 = vmatmul.msk.f32.gmra.mxu1 %vm117_vm0, %v1275_v18 }
 0x5b3   :  { %v674_v21 = vpop.f32.mrf.mxu1 }
 0x5bb   :  { %v677_v3 = vpop.f32.mrf.mxu1 }
 0x5bc   :  { %v680_v4 = vpack.c.bf16 %v677_v3, %v674_v21 }
 0x5be   :  { %686 = vrot.lane.b32.xlu2 %v680_v4, %s1034_s20 }
 0x5c6   :  { %442 = vrot.lane.b32.xlu2 %v1256_v39, %s1034_s20 }
 0x618   :  { %v687_v5 = vpop.permute.xlu2 %686 }
 0x619   :  { %808 = vmatmul.msk.bf16.vlgmr.msra.gmra.mxu3 %vm117_vm0, %v687_v5 }
 0x620   :  { %v443_v6 = vpop.permute.xlu2 %442 }
 0x621   :  { %v452_v7 = vsel %vm117_vm0, %v443_v6, 0.0 }
 0x622   :  { %456 = vst [vmem:[#allocation11 + $0x10] sm:$0xff] %v452_v7 }
 0x623   :  { %748 = dma.vmem_to_hbm [thread:$0]  %s741_s27, 512, %s743_s23, [#allocation12], %s1024_s17, %s1024_s17, %s1025_s18  }
 0x69c   :  { %v712_v39 = vpop.f32.mrf.mxu3 }
 0x69d   :  { %v717_v8 = vadd.f32 %v712_v39, %v674_v21 }
 0x69f   :  { %v719_v9 = vsel %vm117_vm0, %v717_v8, 0.0 }
 0x6a0   :  { %721 = vst [vmem:[#allocation10] sm:$0xff] %v719_v9 }
 0x6a4   :  { %v714_v18 = vpop.f32.mrf.mxu3 }
 0x6a5   :  { %v718_v10 = vadd.f32 %v714_v18, %v677_v3 }
 0x6a7   :  { %v720_v11 = vsel %vm117_vm0, %v718_v10, 0.0 }
 0x6a8   :  { %722 = vst [vmem:[#allocation10 + $0x8] sm:$0xff] %v720_v11 }
 0x6a9   :  { %735 = dma.vmem_to_hbm [thread:$0]  %s728_s25, 256, %s730_s6, [#allocation4], %s1024_s17, %s1024_s17, %s1025_s18  }
 0x6aa   :  { %1019 = dma.done.wait [#allocation4], 256  }
 0x6ab   :  { %1020 = vsyncadd [#allocation4], 4294967040 }
 0x6ac   :  { %1021 = dma.done.wait [#allocation12], 512  }
 0x6ad   :  { %1022 = vsyncadd [#allocation12], 4294966784 }
 0x6ae   :  { %757 = vsyncpa [#allocation3], 1 }
 0x6af   :  { %758 = vsyncpa [#allocation6], 1 }
 0x6b0   :  { %759 = vsyncpa [#allocation9], 1 }
 0x6b1   :  { %760 = vsyncpa [#allocation4], 1 }
 0x6b2   :  { %761 = vsyncpa [#allocation12], 1 }

</bundles_post_ra>
